<compile_context>
chip_gen: v6e
topology: v6e:2x2x1
jax: 0.10.0
libtpu: 0.0.40
codegen_flags: <defaults>
</compile_context>

<pallas_src>
import functools

import jax
import jax.numpy as jnp
from jax.experimental import pallas as pl
from jax.experimental.pallas import tpu as pltpu


# --------------------------------------------------------------------------- #
# Kernel 1: fused K|V projection, computed ONCE over the whole (padded) batch.
#   kv = concat([txt, img]) @ [Wk | Wv] + [bk | bv]
# implemented concat-free with per-modality weight halves.
# --------------------------------------------------------------------------- #
def _kv_proj_kernel(txt_ref, img_ref, wkv_t_ref, wkv_i_ref, bkv_ref,
                    k_ref, v_ref, *, h2):
    kv = (jnp.dot(txt_ref[...], wkv_t_ref[...],
                  preferred_element_type=jnp.float32)
          + jnp.dot(img_ref[...], wkv_i_ref[...],
                    preferred_element_type=jnp.float32)
          + bkv_ref[...])
    # Static lane split of the fused [tm, 4H] result; K/V are stored bf16 so
    # the attention kernel's matmuls need no further casts of K/V (v5e VPU).
    k_ref[...] = kv[:, :h2].astype(k_ref.dtype)
    v_ref[...] = kv[:, h2:].astype(v_ref.dtype)


# --------------------------------------------------------------------------- #
# Kernel 2: Q projection (per query-row tile) + attention + classifier.
# K/V arrive precomputed (bf16, constant block index -> VMEM resident).
# --------------------------------------------------------------------------- #
def _attn_head_kernel(txt_q_ref, img_q_ref, k_ref, v_ref,
                      wq_t_ref, wq_i_ref, bq_ref, wc_ref, bc_ref,
                      out_ref, *, valid_b):
    cdt = k_ref.dtype                               # matmul compute dtype (bf16)

    # q = concat([txt, img]) @ Wq + bq, concat-free via split weights.
    q = (jnp.dot(txt_q_ref[...], wq_t_ref[...],
                 preferred_element_type=jnp.float32)
         + jnp.dot(img_q_ref[...], wq_i_ref[...],
                   preferred_element_type=jnp.float32)
         + bq_ref[...])

    # attention_scores = Q @ K.transpose(1, 0): contract last dims directly on
    # the MXU (no transpose / relayout).
    scores = jax.lax.dot_general(
        q.astype(cdt), k_ref[...],
        dimension_numbers=(((1,), (1,)), ((), ())),
        preferred_element_type=jnp.float32)                   # [TM, Bp]

    # nn.Softmax(dim=1) over the batch axis; mask padded key columns so the
    # sublane padding does not change the normalization.
    col = jax.lax.broadcasted_iota(jnp.int32, scores.shape, 1)
    scores = jnp.where(col < valid_b, scores, -jnp.inf)

    m = jnp.max(scores, axis=1, keepdims=True)
    e = jnp.exp(scores - m)
    attn = e / jnp.sum(e, axis=1, keepdims=True)    # exact divide (torch parity)

    weighted = jnp.dot(attn.astype(cdt), v_ref[...],
                       preferred_element_type=jnp.float32)    # [TM, 2H]

    # classifier (Linear(2H -> num_classes), zero-padded to 128 output lanes).
    # TODO(synk): the reference __init__ defines no classifier for
    # fusion_method == 'attention'; we implement the Linear(hidden*2,
    # num_classes) its forward pass requires.
    out_ref[...] = (jnp.dot(weighted.astype(cdt), wc_ref[...],
                            preferred_element_type=jnp.float32)
                    + bc_ref[...]).astype(out_ref.dtype)


# --------------------------------------------------------------------------- #
# Wrapper: padding, weight splitting / fusion, BlockSpecs / grids
# --------------------------------------------------------------------------- #
def fused_attention_classify(txt, img, wq, bq, wk, bk, wv, bv, wc, bc,
                             *, compute_dtype=jnp.bfloat16, block_q=256,
                             vmem_limit_bytes=48 * 1024 * 1024):
    """SelfAttention(hidden*2) + classifier head as two Pallas kernels.

    txt, img: [B, H] pooled text / image features (f32).
    Weights stored pre-transposed ([in, out]) so y = x @ W + b.
    """
    B, H = txt.shape
    H2 = 2 * H
    nc = wc.shape[-1]

    # --- padding: sublane-multiple batch, lane-dense (128-wide) output -------
    b_pad8 = ((B + 7) // 8) * 8
    tm = min(block_q, b_pad8)
    b_pad = ((b_pad8 + tm - 1) // tm) * tm
    nc_pad = ((nc + 127) // 128) * 128
    n_tiles = b_pad // tm

    def pad_rows(a):
        return jnp.pad(a, ((0, b_pad - a.shape[0]), (0, 0)))

    txt_p = pad_rows(txt).astype(compute_dtype)
    img_p = pad_rows(img).astype(compute_dtype)

    # Per-modality weight halves replace the torch.cat; K|V fused along N.
    wq_t = wq[:H].astype(compute_dtype)
    wq_i = wq[H:].astype(compute_dtype)
    wkv = jnp.concatenate([wk, wv], axis=1)                      # [2H, 4H]
    wkv_t = wkv[:H].astype(compute_dtype)
    wkv_i = wkv[H:].astype(compute_dtype)
    wc_p = jnp.pad(wc, ((0, 0), (0, nc_pad - nc))).astype(compute_dtype)

    # Biases stay f32 (added to the f32 accumulators on the VPU).
    bq_f = bq.astype(jnp.float32)
    bkv = jnp.concatenate([bk, bv], axis=1).astype(jnp.float32)  # [1, 4H]
    bc_p = jnp.pad(bc, ((0, 0), (0, nc_pad - nc))).astype(jnp.float32)

    def _tile_spec(shape):
        return pl.BlockSpec(shape, lambda i: (i, 0))

    def _const_spec(shape, single_buffer):
        if single_buffer:
            # Constant block index -> DMA'd once; single-buffer to halve VMEM.
            return pl.BlockSpec(shape, lambda i: (0, 0),
                                pipeline_mode=pl.Buffered(1))
        return pl.BlockSpec(shape, lambda i: (0, 0))

    def _run(single_buffer):
        cp = pltpu.CompilerParams(dimension_semantics=("parallel",),
                                  vmem_limit_bytes=vmem_limit_bytes)

        # ---- pass 1: K / V projection, computed once for the batch ----------
        kv_flops = 2 * 2 * b_pad * H * (4 * H)
        kv_bytes = ((2 * b_pad * H + 2 * H * 4 * H) * 2
                    + 4 * H * 4 + 2 * b_pad * H2 * 2)
        k_mat, v_mat = pl.pallas_call(
            functools.partial(_kv_proj_kernel, h2=H2),
            out_shape=(jax.ShapeDtypeStruct((b_pad, H2), compute_dtype),
                       jax.ShapeDtypeStruct((b_pad, H2), compute_dtype)),
            grid=(n_tiles,),
            in_specs=[
                _tile_spec((tm, H)),                       # txt rows
                _tile_spec((tm, H)),                       # img rows
                _const_spec((H, 4 * H), single_buffer),    # Wk|Wv (text half)
                _const_spec((H, 4 * H), single_buffer),    # Wk|Wv (image half)
                _const_spec((1, 4 * H), single_buffer),    # bk|bv
            ],
            out_specs=(_tile_spec((tm, H2)), _tile_spec((tm, H2))),
            compiler_params=cp,
            cost_estimate=pl.CostEstimate(flops=kv_flops, transcendentals=0,
                                          bytes_accessed=kv_bytes),
        )(txt_p, img_p, wkv_t, wkv_i, bkv)

        # ---- pass 2: Q projection + attention + classifier ------------------
        # TODO(synk): for very large batches (Bp >> block_q, e.g. 4096) switch
        # to a flash-style 2D grid (parallel query tiles x arbitrary key tiles
        # with online-softmax m/l/acc scratch) so the [TM, Bp] scores and the
        # full K/V never have to be VMEM-resident at once.
        at_flops = (2 * 2 * b_pad * H * H2          # Q projection
                    + 2 * b_pad * b_pad * H2        # Q @ K^T
                    + 2 * b_pad * b_pad * H2        # P @ V
                    + 2 * b_pad * H2 * nc_pad)      # classifier
        at_bytes = ((2 * b_pad * H + 2 * b_pad * H2) * 2
                    + (2 * H * H2 + H2 * nc_pad) * 2
                    + (H2 + nc_pad) * 4
                    + b_pad * nc_pad * 4)
        out = pl.pallas_call(
            functools.partial(_attn_head_kernel, valid_b=B),
            out_shape=jax.ShapeDtypeStruct((b_pad, nc_pad), jnp.float32),
            grid=(n_tiles,),
            in_specs=[
                _tile_spec((tm, H)),                       # txt (query rows)
                _tile_spec((tm, H)),                       # img (query rows)
                _const_spec((b_pad, H2), single_buffer),   # K (precomputed)
                _const_spec((b_pad, H2), single_buffer),   # V (precomputed)
                _const_spec((H, H2), single_buffer),       # Wq (text half)
                _const_spec((H, H2), single_buffer),       # Wq (image half)
                _const_spec((1, H2), single_buffer),       # bq
                _const_spec((H2, nc_pad), single_buffer),  # classifier W
                _const_spec((1, nc_pad), single_buffer),   # classifier b
            ],
            out_specs=_tile_spec((tm, nc_pad)),
            compiler_params=cp,
            cost_estimate=pl.CostEstimate(flops=at_flops,
                                          transcendentals=b_pad * b_pad,
                                          bytes_accessed=at_bytes),
        )(txt_p, img_p, k_mat, v_mat, wq_t, wq_i, bq_f, wc_p, bc_p)
        return out

    try:
        out = _run(single_buffer=True)
    except Exception:
        # Installed jax rejected pipeline_mode=pl.Buffered(1); fall back to
        # default double-buffering (identical math).
        out = _run(single_buffer=False)

    return out[:B, :nc]


# --------------------------------------------------------------------------- #
# Full forward (stub encoders in plain JAX + Pallas fusion head)
# --------------------------------------------------------------------------- #
def multimodal_forward(params, input_ids, image):
    # TODO(synk): pretrained RobertaModel is not reproducible here; the pooled
    # text output [B, H] is emulated with embedding mean-pool + dense + tanh.
    emb = params["tok_emb"][input_ids]                          # [B, S, H]
    txt = jnp.tanh(jnp.mean(emb, axis=1) @ params["w_pool"] + params["b_pool"])

    # TODO(synk): pretrained ResNet backbone is not reproducible here; emulated
    # with global average pooling over NCHW spatial dims + the replacement
    # fc = Linear(in_features, hidden_size) from the module's __init__.
    img = jnp.mean(image, axis=(2, 3)) @ params["w_imgfc"] + params["b_imgfc"]

    # fusion_method == 'attention': concat -> SelfAttention -> classifier
    # (the concat happens implicitly inside the kernels via split weights).
    return fused_attention_classify(
        txt, img,
        params["wq"], params["bq"],
        params["wk"], params["bk"],
        params["wv"], params["bv"],
        params["wc"], params["bc"],
    )


# Pure-JAX reference of the kernels' math (bf16 matmul inputs / f32 accumulate,
# bf16-stored K/V, exact softmax).  Mixed precision intentionally diverges from
# the pure-f32 torch reference; documented, tolerance below accounts for it.
def _reference_head(x, wq, bq, wk, bk, wv, bv, wc, bc,
                    compute_dtype=jnp.bfloat16):
    cdt = compute_dtype
    xc = x.astype(cdt)
    q = jnp.dot(xc, wq.astype(cdt), preferred_element_type=jnp.float32) + bq
    k = (jnp.dot(xc, wk.astype(cdt), preferred_element_type=jnp.float32)
         + bk).astype(cdt)
    v = (jnp.dot(xc, wv.astype(cdt), preferred_element_type=jnp.float32)
         + bv).astype(cdt)
    scores = jax.lax.dot_general(q.astype(cdt), k,
                                 dimension_numbers=(((1,), (1,)), ((), ())),
                                 preferred_element_type=jnp.float32)
    attn = jax.nn.softmax(scores, axis=1)
    weighted = jnp.dot(attn.astype(cdt), v, preferred_element_type=jnp.float32)
    return jnp.dot(weighted.astype(cdt), wc.astype(cdt),
                   preferred_element_type=jnp.float32) + bc


# --------------------------------------------------------------------------- #
# Main
# --------------------------------------------------------------------------- #
if __name__ == "__main__":
    B, S, C, HW = 2, 8, 4, 16          # batch, seq len, image channels, spatial
    H = 32                             # config.hidden_size (small synthetic)
    H2 = 2 * H                         # concat width
    NUM_CLASSES = 3
    VOCAB = 50

    key = jax.random.PRNGKey(0)
    ks = jax.random.split(key, 16)

    def init(k, shape, scale=0.05):
        return (scale * jax.random.normal(k, shape)).astype(jnp.float32)

    params = {
        # stub text encoder
        "tok_emb": init(ks[0], (VOCAB, H)),
        "w_pool":  init(ks[1], (H, H)),
        "b_pool":  init(ks[2], (H,)),
        # stub image encoder head (replacement fc)
        "w_imgfc": init(ks[3], (C, H)),
        "b_imgfc": init(ks[4], (H,)),
        # SelfAttention(hidden*2): query / key / value Linears (stored [in, out])
        "wq": init(ks[5], (H2, H2)), "bq": init(ks[6], (1, H2)),
        "wk": init(ks[7], (H2, H2)), "bk": init(ks[8], (1, H2)),
        "wv": init(ks[9], (H2, H2)), "bv": init(ks[10], (1, H2)),
        # classifier Linear(2H -> num_classes)
        "wc": init(ks[11], (H2, NUM_CLASSES)), "bc": init(ks[12], (1, NUM_CLASSES)),
    }

    # deterministic example inputs
    input_ids = jax.random.randint(ks[13], (B, S), 0, VOCAB)              # text
    image = jax.random.normal(ks[14], (B, C, HW, HW), dtype=jnp.float32)  # NCHW

    out = multimodal_forward(params, input_ids, image)
    out = jax.block_until_ready(out)
    assert out.shape == (B, NUM_CLASSES)

    # verify the Pallas head against pure JAX (same bf16/f32 mixed precision)
    emb = params["tok_emb"][input_ids]
    txt = jnp.tanh(jnp.mean(emb, axis=1) @ params["w_pool"] + params["b_pool"])
    img = jnp.mean(image, axis=(2, 3)) @ params["w_imgfc"] + params["b_imgfc"]
    x = jnp.concatenate([txt, img], axis=1)
    ref = _reference_head(x, params["wq"], params["bq"], params["wk"], params["bk"],
                          params["wv"], params["bv"], params["wc"], params["bc"])
    assert jnp.allclose(out, ref, rtol=1e-2, atol=2e-3), (out, ref)

    print("KERNEL_OK")
</pallas_src>

<mosaic_0001>
module attributes {stable_mosaic.version = 11 : i64} {
  func.func @_kv_proj_kernel(%arg0: i32, %arg1: memref<8x32xbf16, #tpu.memory_space<vmem>>, %arg2: memref<8x32xbf16, #tpu.memory_space<vmem>>, %arg3: memref<32x128xbf16, #tpu.memory_space<vmem>>, %arg4: memref<32x128xbf16, #tpu.memory_space<vmem>>, %arg5: memref<1x128xf32, #tpu.memory_space<vmem>>, %arg6: memref<8x64xbf16, #tpu.memory_space<vmem>>, %arg7: memref<8x64xbf16, #tpu.memory_space<vmem>>) attributes {dimension_semantics = [#tpu.dimension_semantics<parallel>], iteration_bounds = array<i64: 1>, scalar_prefetch = 0 : i64, scratch_operands = 0 : i64, tpu.core_type = #tpu.core_type<tc>, window_params = [{transform_indices = @transform_0, window_bounds = array<i64: 8, 32>}, {transform_indices = @transform_1, window_bounds = array<i64: 8, 32>}, {pipeline_mode = #tpu.pipeline_mode<synchronous>, transform_indices = @transform_2, window_bounds = array<i64: 32, 128>}, {pipeline_mode = #tpu.pipeline_mode<synchronous>, transform_indices = @transform_3, window_bounds = array<i64: 32, 128>}, {pipeline_mode = #tpu.pipeline_mode<synchronous>, transform_indices = @transform_4, window_bounds = array<i64: 1, 128>}, {transform_indices = @transform_5, window_bounds = array<i64: 8, 64>}, {transform_indices = @transform_6, window_bounds = array<i64: 8, 64>}]} {
    %c0 = arith.constant 0 : index
    %c0_0 = arith.constant 0 : index
    %0 = vector.load %arg1[%c0, %c0_0] : memref<8x32xbf16, #tpu.memory_space<vmem>>, vector<8x32xbf16>
    %c0_1 = arith.constant 0 : index
    %c0_2 = arith.constant 0 : index
    %1 = vector.load %arg3[%c0_1, %c0_2] : memref<32x128xbf16, #tpu.memory_space<vmem>>, vector<32x128xbf16>
    %cst = arith.constant dense<0.000000e+00> : vector<8x128xf32>
    %2 = tpu.matmul %0, %1, %cst {dimension_numbers = #tpu.dot_dimension_numbers<[1], [0], [0], [1], [0, 0, 1, 1], [], []>} : vector<8x32xbf16>, vector<32x128xbf16>, vector<8x128xf32> -> vector<8x128xf32>
    %c0_3 = arith.constant 0 : index
    %c0_4 = arith.constant 0 : index
    %3 = vector.load %arg2[%c0_3, %c0_4] : memref<8x32xbf16, #tpu.memory_space<vmem>>, vector<8x32xbf16>
    %c0_5 = arith.constant 0 : index
    %c0_6 = arith.constant 0 : index
    %4 = vector.load %arg4[%c0_5, %c0_6] : memref<32x128xbf16, #tpu.memory_space<vmem>>, vector<32x128xbf16>
    %cst_7 = arith.constant dense<0.000000e+00> : vector<8x128xf32>
    %5 = tpu.matmul %3, %4, %cst_7 {dimension_numbers = #tpu.dot_dimension_numbers<[1], [0], [0], [1], [0, 0, 1, 1], [], []>} : vector<8x32xbf16>, vector<32x128xbf16>, vector<8x128xf32> -> vector<8x128xf32>
    %6 = arith.addf %2, %5 : vector<8x128xf32>
    %c0_8 = arith.constant 0 : index
    %c0_9 = arith.constant 0 : index
    %7 = vector.load %arg5[%c0_8, %c0_9] : memref<1x128xf32, #tpu.memory_space<vmem>>, vector<1x128xf32>
    %8 = vector.broadcast %7 : vector<1x128xf32> to vector<8x128xf32>
    %9 = arith.addf %6, %8 : vector<8x128xf32>
    %10 = vector.extract_strided_slice %9 {offsets = [0, 0], sizes = [8, 64], strides = [1, 1]} : vector<8x128xf32> to vector<8x64xf32>
    %11 = arith.truncf %10 : vector<8x64xf32> to vector<8x64xbf16>
    %c0_10 = arith.constant 0 : index
    %c0_11 = arith.constant 0 : index
    %12 = vector.load %arg6[%c0_10, %c0_11] : memref<8x64xbf16, #tpu.memory_space<vmem>>, vector<8x64xbf16>
    tpu.vector_store %arg6[%c0_10, %c0_11], %11 {strides = array<i32>} : memref<8x64xbf16, #tpu.memory_space<vmem>>, vector<8x64xbf16>,
    %13 = vector.extract_strided_slice %9 {offsets = [0, 64], sizes = [8, 64], strides = [1, 1]} : vector<8x128xf32> to vector<8x64xf32>
    %14 = arith.truncf %13 : vector<8x64xf32> to vector<8x64xbf16>
    %c0_12 = arith.constant 0 : index
    %c0_13 = arith.constant 0 : index
    %15 = vector.load %arg7[%c0_12, %c0_13] : memref<8x64xbf16, #tpu.memory_space<vmem>>, vector<8x64xbf16>
    tpu.vector_store %arg7[%c0_12, %c0_13], %14 {strides = array<i32>} : memref<8x64xbf16, #tpu.memory_space<vmem>>, vector<8x64xbf16>,
    return
  }
  func.func @transform_0(%arg0: i32) -> (i32, i32) {
    %c0_i32 = arith.constant 0 : i32
    %c0_i32_0 = arith.constant 0 : i32
    return %arg0, %c0_i32 : i32, i32
  }
  func.func @transform_1(%arg0: i32) -> (i32, i32) {
    %c0_i32 = arith.constant 0 : i32
    %c0_i32_0 = arith.constant 0 : i32
    return %arg0, %c0_i32 : i32, i32
  }
  func.func @transform_2(%arg0: i32) -> (i32, i32) {
    %c0_i32 = arith.constant 0 : i32
    %c0_i32_0 = arith.constant 0 : i32
    %c0_i32_1 = arith.constant 0 : i32
    return %c0_i32, %c0_i32_0 : i32, i32
  }
  func.func @transform_3(%arg0: i32) -> (i32, i32) {
    %c0_i32 = arith.constant 0 : i32
    %c0_i32_0 = arith.constant 0 : i32
    %c0_i32_1 = arith.constant 0 : i32
    return %c0_i32, %c0_i32_0 : i32, i32
  }
  func.func @transform_4(%arg0: i32) -> (i32, i32) {
    %c0_i32 = arith.constant 0 : i32
    %c0_i32_0 = arith.constant 0 : i32
    %c0_i32_1 = arith.constant 0 : i32
    return %c0_i32, %c0_i32_0 : i32, i32
  }
  func.func @transform_5(%arg0: i32) -> (i32, i32) {
    %c0_i32 = arith.constant 0 : i32
    %c0_i32_0 = arith.constant 0 : i32
    return %arg0, %c0_i32 : i32, i32
  }
  func.func @transform_6(%arg0: i32) -> (i32, i32) {
    %c0_i32 = arith.constant 0 : i32
    %c0_i32_0 = arith.constant 0 : i32
    return %arg0, %c0_i32 : i32, i32
  }
}

module attributes {stable_mosaic.version = 11 : i64} {
  func.func @_kv_proj_kernel(%arg0: i32, %arg1: memref<8x32xbf16, #tpu.memory_space<vmem>>, %arg2: memref<8x32xbf16, #tpu.memory_space<vmem>>, %arg3: memref<32x128xbf16, #tpu.memory_space<vmem>>, %arg4: memref<32x128xbf16, #tpu.memory_space<vmem>>, %arg5: memref<1x128xf32, #tpu.memory_space<vmem>>, %arg6: memref<8x64xbf16, #tpu.memory_space<vmem>>, %arg7: memref<8x64xbf16, #tpu.memory_space<vmem>>) attributes {dimension_semantics = [#tpu.dimension_semantics<parallel>], iteration_bounds = array<i64: 1>, scalar_prefetch = 0 : i64, scratch_operands = 0 : i64, tpu.core_type = #tpu.core_type<tc>, window_params = [{transform_indices = @transform_0, window_bounds = array<i64: 8, 32>}, {transform_indices = @transform_1, window_bounds = array<i64: 8, 32>}, {pipeline_mode = #tpu.pipeline_mode<synchronous>, transform_indices = @transform_2, window_bounds = array<i64: 32, 128>}, {pipeline_mode = #tpu.pipeline_mode<synchronous>, transform_indices = @transform_3, window_bounds = array<i64: 32, 128>}, {pipeline_mode = #tpu.pipeline_mode<synchronous>, transform_indices = @transform_4, window_bounds = array<i64: 1, 128>}, {transform_indices = @transform_5, window_bounds = array<i64: 8, 64>}, {transform_indices = @transform_6, window_bounds = array<i64: 8, 64>}]} {
    %c0 = arith.constant 0 : index
    %c0_0 = arith.constant 0 : index
    %0 = vector.load %arg1[%c0, %c0_0] : memref<8x32xbf16, #tpu.memory_space<vmem>>, vector<8x32xbf16>
    %c0_1 = arith.constant 0 : index
    %c0_2 = arith.constant 0 : index
    %1 = vector.load %arg3[%c0_1, %c0_2] : memref<32x128xbf16, #tpu.memory_space<vmem>>, vector<32x128xbf16>
    %cst = arith.constant dense<0.000000e+00> : vector<8x128xf32>
    %2 = tpu.matmul %0, %1, %cst {dimension_numbers = #tpu.dot_dimension_numbers<[1], [0], [0], [1], [0, 0, 1, 1], [], []>} : vector<8x32xbf16>, vector<32x128xbf16>, vector<8x128xf32> -> vector<8x128xf32>
    %c0_3 = arith.constant 0 : index
    %c0_4 = arith.constant 0 : index
    %3 = vector.load %arg2[%c0_3, %c0_4] : memref<8x32xbf16, #tpu.memory_space<vmem>>, vector<8x32xbf16>
    %c0_5 = arith.constant 0 : index
    %c0_6 = arith.constant 0 : index
    %4 = vector.load %arg4[%c0_5, %c0_6] : memref<32x128xbf16, #tpu.memory_space<vmem>>, vector<32x128xbf16>
    %cst_7 = arith.constant dense<0.000000e+00> : vector<8x128xf32>
    %5 = tpu.matmul %3, %4, %cst_7 {dimension_numbers = #tpu.dot_dimension_numbers<[1], [0], [0], [1], [0, 0, 1, 1], [], []>} : vector<8x32xbf16>, vector<32x128xbf16>, vector<8x128xf32> -> vector<8x128xf32>
    %6 = arith.addf %2, %5 : vector<8x128xf32>
    %c0_8 = arith.constant 0 : index
    %c0_9 = arith.constant 0 : index
    %7 = vector.load %arg5[%c0_8, %c0_9] : memref<1x128xf32, #tpu.memory_space<vmem>>, vector<1x128xf32>
    %8 = vector.broadcast %7 : vector<1x128xf32> to vector<8x128xf32>
    %9 = arith.addf %6, %8 : vector<8x128xf32>
    %10 = vector.extract_strided_slice %9 {offsets = [0, 0], sizes = [8, 64], strides = [1, 1]} : vector<8x128xf32> to vector<8x64xf32>
    %11 = arith.truncf %10 : vector<8x64xf32> to vector<8x64xbf16>
    %c0_10 = arith.constant 0 : index
    %c0_11 = arith.constant 0 : index
    %12 = vector.load %arg6[%c0_10, %c0_11] : memref<8x64xbf16, #tpu.memory_space<vmem>>, vector<8x64xbf16>
    tpu.vector_store %arg6[%c0_10, %c0_11], %11 {strides = array<i32>} : memref<8x64xbf16, #tpu.memory_space<vmem>>, vector<8x64xbf16>,
    %13 = vector.extract_strided_slice %9 {offsets = [0, 64], sizes = [8, 64], strides = [1, 1]} : vector<8x128xf32> to vector<8x64xf32>
    %14 = arith.truncf %13 : vector<8x64xf32> to vector<8x64xbf16>
    %c0_12 = arith.constant 0 : index
    %c0_13 = arith.constant 0 : index
    %15 = vector.load %arg7[%c0_12, %c0_13] : memref<8x64xbf16, #tpu.memory_space<vmem>>, vector<8x64xbf16>
    tpu.vector_store %arg7[%c0_12, %c0_13], %14 {strides = array<i32>} : memref<8x64xbf16, #tpu.memory_space<vmem>>, vector<8x64xbf16>,
    return
  }
  func.func @transform_0(%arg0: i32) -> (i32, i32) {
    %c0_i32 = arith.constant 0 : i32
    %c0_i32_0 = arith.constant 0 : i32
    return %arg0, %c0_i32 : i32, i32
  }
  func.func @transform_1(%arg0: i32) -> (i32, i32) {
    %c0_i32 = arith.constant 0 : i32
    %c0_i32_0 = arith.constant 0 : i32
    return %arg0, %c0_i32 : i32, i32
  }
  func.func @transform_2(%arg0: i32) -> (i32, i32) {
    %c0_i32 = arith.constant 0 : i32
    %c0_i32_0 = arith.constant 0 : i32
    %c0_i32_1 = arith.constant 0 : i32
    return %c0_i32, %c0_i32_0 : i32, i32
  }
  func.func @transform_3(%arg0: i32) -> (i32, i32) {
    %c0_i32 = arith.constant 0 : i32
    %c0_i32_0 = arith.constant 0 : i32
    %c0_i32_1 = arith.constant 0 : i32
    return %c0_i32, %c0_i32_0 : i32, i32
  }
  func.func @transform_4(%arg0: i32) -> (i32, i32) {
    %c0_i32 = arith.constant 0 : i32
    %c0_i32_0 = arith.constant 0 : i32
    %c0_i32_1 = arith.constant 0 : i32
    return %c0_i32, %c0_i32_0 : i32, i32
  }
  func.func @transform_5(%arg0: i32) -> (i32, i32) {
    %c0_i32 = arith.constant 0 : i32
    %c0_i32_0 = arith.constant 0 : i32
    return %arg0, %c0_i32 : i32, i32
  }
  func.func @transform_6(%arg0: i32) -> (i32, i32) {
    %c0_i32 = arith.constant 0 : i32
    %c0_i32_0 = arith.constant 0 : i32
    return %arg0, %c0_i32 : i32, i32
  }
}

</mosaic_0001>

<bundles_post_ra>
// kernel: tpu_custom_call.1
= control target key start
LH: loop header
LB: loop body
LE: loop exit
PB: predicated region body
PF: predicated region fallthrough
CT: control target
= control target key end

     0   :  { %12 = vsyncpa [#allocation3], 0  ;;  %s494_s0 = inlined_call_operand.hbm [shape: bf16[8,32], index: 0, kind: input, shape index: {}]   ;;  %s495_s1 = inlined_call_operand.hbm [shape: bf16[8,32], index: 1, kind: input, shape index: {}]   ;;  %s496_s2 = inlined_call_operand.hbm [shape: bf16[32,128], index: 2, kind: input, shape index: {}]   ;;  %s497_s3 = inlined_call_operand.hbm [shape: bf16[32,128], index: 3, kind: input, shape index: {}]   ;;  %s498_s4 = inlined_call_operand.vmem [shape: f32[1,128], index: 4, kind: input, shape index: {}]   ;;  %s499_s5 = inlined_call_operand.hbm [shape: bf16[8,64], index: 5, kind: output, shape index: {0}]   ;;  %s500_s6 = inlined_call_operand.hbm [shape: bf16[8,64], index: 6, kind: output, shape index: {1}]  }
   0x1   :  { %13 = vsyncpa [#allocation6], 0 }
   0x2   :  { %14 = vsyncpa [#allocation9], 0 }
   0x3   :  { %15 = vsyncpa [#allocation4], 0 }
   0x4   :  { %16 = vsyncpa [#allocation12], 0  ;;  %s421_s21 = smov [#allocation5]   ;;  %s422_s23 = smov [#allocation2]  }
   0x5   :  { %s33_s22 = sshll.u32 %s421_s21, 4  ;;  %s23_s24 = sshll.u32 %s422_s23, 4  ;;  %s34_s22 = int_to_ptr.vmem [resolvable:$true] %s33_s22  ;;  %s24_s24 = int_to_ptr.vmem [resolvable:$true] %s23_s24 }
   0x6   :  { %s299_s25 = scalar_lea.vmem %s34_s22, 64  ;;  %p304_p1 = scmp.lt.s32.totalorder %s34_s22, %s34_s22 }
   0x7   :  { %p300_p0 = scmp.ne.s32.totalorder %s34_s22, %s299_s25  ;;  %p305_p2 = scmp.lt.s32.totalorder %s299_s25, %s299_s25 }
   0x9   :  { %p306_p3 = por %p305_p2, %p304_p1 }
   0xb   :  { %p307_p4 = pnand %p306_p3, %p300_p0 }
   0xd   :  { %310 = shalt.err (!%p307_p4)
}
   0xe   :  { %36 = dma.hbm_to_vmem [thread:$0]  %s495_s1, 64, %s34_s22, [#allocation6]  }
   0xf   :  { %s319_s28 = scalar_lea.vmem %s24_s24, 64  ;;  %p324_p6 = scmp.lt.s32.totalorder %s24_s24, %s24_s24 }
  0x10   :  { %p320_p5 = scmp.ne.s32.totalorder %s24_s24, %s319_s28  ;;  %p325_p7 = scmp.lt.s32.totalorder %s319_s28, %s319_s28 }
  0x12   :  { %p326_p8 = por %p325_p7, %p324_p6 }
  0x14   :  { %p327_p9 = pnand %p326_p8, %p320_p5 }
  0x16   :  { %330 = shalt.err (!%p327_p9)
}
  0x17   :  { %26 = dma.hbm_to_vmem [thread:$0]  %s494_s0, 64, %s24_s24, [#allocation3]  }
  0x18   :  { %s423_s7 = smov [#allocation7]  }
  0x19   :  { %s42_s8 = sshll.u32 %s423_s7, 4  ;;  %s43_s8 = int_to_ptr.vmem [resolvable:$true] %s42_s8 }
  0x1a   :  { %s339_s9 = scalar_lea.vmem %s43_s8, 256  ;;  %p344_p11 = scmp.lt.s32.totalorder %s43_s8, %s43_s8 }
  0x1b   :  { %p340_p10 = scmp.ne.s32.totalorder %s43_s8, %s339_s9  ;;  %p345_p12 = scmp.lt.s32.totalorder %s339_s9, %s339_s9 }
  0x1d   :  { %p346_p13 = por %p345_p12, %p344_p11 }
  0x1f   :  { %p347_p0 = pnand %p346_p13, %p340_p10 }
  0x21   :  { %350 = shalt.err (!%p347_p0)
}
  0x22   :  { %s424_s1 = smov 64   ;;  %s425_s10 = smov 4  }
  0x23   :  { %48 = dma.hbm_to_vmem [thread:$0]  %s496_s2, 256, %s43_s8, [#allocation6], %s424_s1, %s424_s1, %s425_s10  }
  0x24   :  { %s426_s13 = smov [#allocation8]  }
  0x25   :  { %s54_s0 = sshll.u32 %s426_s13, 4  ;;  %s55_s0 = int_to_ptr.vmem [resolvable:$true] %s54_s0 }
  0x26   :  { %s359_s14 = scalar_lea.vmem %s55_s0, 256  ;;  %p364_p2 = scmp.lt.s32.totalorder %s55_s0, %s55_s0 }
  0x27   :  { %p360_p1 = scmp.ne.s32.totalorder %s55_s0, %s359_s14  ;;  %p365_p3 = scmp.lt.s32.totalorder %s359_s14, %s359_s14 }
  0x29   :  { %p366_p4 = por %p365_p3, %p364_p2 }
  0x2b   :  { %p367_p5 = pnand %p366_p4, %p360_p1 }
  0x2d   :  { %370 = shalt.err (!%p367_p5)
}
  0x2e   :  { %60 = dma.hbm_to_vmem [thread:$0]  %s497_s3, 256, %s55_s0, [#allocation9], %s424_s1, %s424_s1, %s425_s10  }
  0x2f   :  { %411 = dma.done.wait [#allocation3], 64  }
  0x30   :  { %412 = vsyncadd [#allocation3], 4294967232 }
  0x31   :  { %413 = dma.done.wait [#allocation6], 320  }
  0x32   :  { %414 = vsyncadd [#allocation6], 4294966976 }
  0x33   :  { %415 = dma.done.wait [#allocation9], 256  }
  0x34   :  { %416 = vsyncadd [#allocation9], 4294967040  ;;  %v427_v0 = vmov 0.0   ;;  %vm428_vm0 = vmmov 0   ;;  %v287_v1 = vld [vmem:[#allocation8 + $0x8] sm:$0xff]   ;;  %v288_v2 = vld [vmem:[#allocation7 + $0x8] sm:$0xff]  }
  0x35   :  { %261 = vmatprep.subr.bf16.mxu0 %v427_v0  ;;  %269 = vmatprep.subr.bf16.mxu1 %v427_v0  ;;  %v289_v3 = vld [vmem:[#allocation8] sm:$0xff]   ;;  %v290_v4 = vld [vmem:[#allocation7] sm:$0xff]   ;;  %v81_v5 = vld [vmem:[#allocation5] sm:$0xf]  ;;  %vm98_vm1 = vcmask 261120   ;;  %s429_s17 = smov [#allocation10]  }
  0x36   :  { %265 = vmatprep.mubr.msk.bf16.mxu0 %vm428_vm0, %v427_v0  ;;  %273 = vmatprep.mubr.msk.bf16.mxu1 %vm428_vm0, %v427_v0  ;;  %v76_v6 = vld [vmem:[#allocation2] sm:$0xf]  ;;  %s221_s18 = sshll.u32 %s429_s17, 4  ;;  %vm206_vm2 = vcmask 519168   ;;  %s222_s18 = int_to_ptr.vmem [resolvable:$true] %s221_s18 }
  0x37   :  { %262 = vmatpush3.bf16.msra.mxu0 %v287_v1  ;;  %270 = vmatpush3.bf16.msra.mxu1 %v288_v2  ;;  %v252_v9 = vld [vmem:[%s498_s4] ss:$0 sm:$0xff]  ;;  %s371_s19 = scalar_lea.vmem %s222_s18, 64  ;;  %p376_p7 = scmp.lt.s32.totalorder %s222_s18, %s222_s18 }
  0x38   :  { %263 = vmatprep.subr.bf16.mxu0 %v427_v0  ;;  %271 = vmatprep.subr.bf16.mxu1 %v427_v0  ;;  %p372_p6 = scmp.ne.s32.totalorder %s222_s18, %s371_s19  ;;  %p377_p8 = scmp.lt.s32.totalorder %s371_s19, %s371_s19 }
  0x3a   :  { %p378_p9 = por %p377_p8, %p376_p7 }
  0x3b   :  { %264 = vmatpush3.bf16.msra.mxu0 %v289_v3  ;;  %272 = vmatpush3.bf16.msra.mxu1 %v290_v4 }
  0x3c   :  { %p379_p10 = pnand %p378_p9, %p372_p6 }
  0x3e   :  { %266 = vmatmul.mubr.msk.bf16.vlgmr.msra.gmra.mxu0 %vm98_vm1, %v81_v5  ;;  %274 = vmatmul.mubr.msk.bf16.vlgmr.msra.gmra.mxu1 %vm98_vm1, %v76_v6 }
  0xfe   :  { %v136_v7 = vpop.f32.mrf.mxu0  ;;  %v191_v8 = vpop.f32.mrf.mxu1 }
  0xff   :  { %v192_v10 = vadd.f32 %v191_v8, %v136_v7 }
 0x100   :  { %v267_v11 = vpop.f32.mrf.mxu0  ;;  %v275_v12 = vpop.f32.mrf.mxu1 }
 0x101   :  { %v204_v14 = vadd.f32 %v252_v9, %v192_v10 }
 0x102   :  { %v139_v13 = vpop.f32.mrf.mxu0  ;;  %v194_v15 = vpop.f32.mrf.mxu1 }
 0x103   :  { %v205_v17 = vpack.c.bf16 %v204_v14, %v204_v14 }
 0x104   :  { %v268_v16 = vpop.f32.mrf.mxu0  ;;  %v276_v18 = vpop.f32.mrf.mxu1 }
 0x105   :  { %211 = vrot.lane.b32.xlu0 %v205_v17, %s424_s1  ;;  %207 = vst.msk [vmem:[#allocation10] sm:$0xf] %vm206_vm2, %v205_v17 }
 0x106   :  { %382 = shalt.err (!%p379_p10)
}
 0x107   :  { %224 = dma.vmem_to_hbm [thread:$0]  %s222_s18, 64, %s499_s5, [#allocation4]  }
 0x108   :  { %s430_s21 = smov [#allocation11]  }
 0x109   :  { %s231_s22 = sshll.u32 %s430_s21, 4  ;;  %s232_s22 = int_to_ptr.vmem [resolvable:$true] %s231_s22 }
 0x10a   :  { %s391_s23 = scalar_lea.vmem %s232_s22, 64  ;;  %p396_p12 = scmp.lt.s32.totalorder %s232_s22, %s232_s22 }
 0x10b   :  { %p392_p11 = scmp.ne.s32.totalorder %s232_s22, %s391_s23  ;;  %p397_p13 = scmp.lt.s32.totalorder %s391_s23, %s391_s23 }
 0x10d   :  { %p398_p0 = por %p397_p13, %p396_p12 }
 0x10f   :  { %p399_p1 = pnand %p398_p0, %p392_p11 }
 0x177   :  { %v212_v19 = vpop.permute.xlu0 %211 }
 0x178   :  { %214 = vst.msk [vmem:[#allocation11] sm:$0xf] %vm206_vm2, %v212_v19 }
 0x179   :  { %402 = shalt.err (!%p399_p1)
}
 0x17a   :  { %234 = dma.vmem_to_hbm [thread:$0]  %s232_s22, 64, %s500_s6, [#allocation12]  }
 0x17b   :  { %417 = dma.done.wait [#allocation4], 64  }
 0x17c   :  { %418 = vsyncadd [#allocation4], 4294967232 }
 0x17d   :  { %419 = dma.done.wait [#allocation12], 64  }
 0x17e   :  { %420 = vsyncadd [#allocation12], 4294967232 }
 0x17f   :  { %241 = vsyncpa [#allocation3], 1 }
 0x180   :  { %242 = vsyncpa [#allocation6], 1 }
 0x181   :  { %243 = vsyncpa [#allocation9], 1 }
 0x182   :  { %244 = vsyncpa [#allocation4], 1 }
 0x183   :  { %245 = vsyncpa [#allocation12], 1 }

// kernel: tpu_custom_call.1
= control target key start
LH: loop header
LB: loop body
LE: loop exit
PB: predicated region body
PF: predicated region fallthrough
CT: control target
= control target key end

     0   :  { %12 = vsyncpa [#allocation3], 0  ;;  %s494_s0 = inlined_call_operand.hbm [shape: bf16[8,32], index: 0, kind: input, shape index: {}]   ;;  %s495_s1 = inlined_call_operand.hbm [shape: bf16[8,32], index: 1, kind: input, shape index: {}]   ;;  %s496_s2 = inlined_call_operand.hbm [shape: bf16[32,128], index: 2, kind: input, shape index: {}]   ;;  %s497_s3 = inlined_call_operand.hbm [shape: bf16[32,128], index: 3, kind: input, shape index: {}]   ;;  %s498_s4 = inlined_call_operand.vmem [shape: f32[1,128], index: 4, kind: input, shape index: {}]   ;;  %s499_s5 = inlined_call_operand.hbm [shape: bf16[8,64], index: 5, kind: output, shape index: {0}]   ;;  %s500_s6 = inlined_call_operand.hbm [shape: bf16[8,64], index: 6, kind: output, shape index: {1}]  }
   0x1   :  { %13 = vsyncpa [#allocation6], 0 }
   0x2   :  { %14 = vsyncpa [#allocation9], 0 }
   0x3   :  { %15 = vsyncpa [#allocation4], 0 }
   0x4   :  { %16 = vsyncpa [#allocation12], 0  ;;  %s421_s21 = smov [#allocation5]   ;;  %s422_s23 = smov [#allocation2]  }
   0x5   :  { %s33_s22 = sshll.u32 %s421_s21, 4  ;;  %s23_s24 = sshll.u32 %s422_s23, 4  ;;  %s34_s22 = int_to_ptr.vmem [resolvable:$true] %s33_s22  ;;  %s24_s24 = int_to_ptr.vmem [resolvable:$true] %s23_s24 }
   0x6   :  { %s299_s25 = scalar_lea.vmem %s34_s22, 64  ;;  %p304_p1 = scmp.lt.s32.totalorder %s34_s22, %s34_s22 }
   0x7   :  { %p300_p0 = scmp.ne.s32.totalorder %s34_s22, %s299_s25  ;;  %p305_p2 = scmp.lt.s32.totalorder %s299_s25, %s299_s25 }
   0x9   :  { %p306_p3 = por %p305_p2, %p304_p1 }
   0xb   :  { %p307_p4 = pnand %p306_p3, %p300_p0 }
   0xd   :  { %310 = shalt.err (!%p307_p4)
}
   0xe   :  { %36 = dma.hbm_to_vmem [thread:$0]  %s495_s1, 64, %s34_s22, [#allocation6]  }
   0xf   :  { %s319_s28 = scalar_lea.vmem %s24_s24, 64  ;;  %p324_p6 = scmp.lt.s32.totalorder %s24_s24, %s24_s24 }
  0x10   :  { %p320_p5 = scmp.ne.s32.totalorder %s24_s24, %s319_s28  ;;  %p325_p7 = scmp.lt.s32.totalorder %s319_s28, %s319_s28 }
  0x12   :  { %p326_p8 = por %p325_p7, %p324_p6 }
  0x14   :  { %p327_p9 = pnand %p326_p8, %p320_p5 }
  0x16   :  { %330 = shalt.err (!%p327_p9)
}
  0x17   :  { %26 = dma.hbm_to_vmem [thread:$0]  %s494_s0, 64, %s24_s24, [#allocation3]  }
  0x18   :  { %s423_s7 = smov [#allocation7]  }
  0x19   :  { %s42_s8 = sshll.u32 %s423_s7, 4  ;;  %s43_s8 = int_to_ptr.vmem [resolvable:$true] %s42_s8 }
  0x1a   :  { %s339_s9 = scalar_lea.vmem %s43_s8, 256  ;;  %p344_p11 = scmp.lt.s32.totalorder %s43_s8, %s43_s8 }
  0x1b   :  { %p340_p10 = scmp.ne.s32.totalorder %s43_s8, %s339_s9  ;;  %p345_p12 = scmp.lt.s32.totalorder %s339_s9, %s339_s9 }
  0x1d   :  { %p346_p13 = por %p345_p12, %p344_p11 }
  0x1f   :  { %p347_p0 = pnand %p346_p13, %p340_p10 }
  0x21   :  { %350 = shalt.err (!%p347_p0)
}
  0x22   :  { %s424_s1 = smov 64   ;;  %s425_s10 = smov 4  }
  0x23   :  { %48 = dma.hbm_to_vmem [thread:$0]  %s496_s2, 256, %s43_s8, [#allocation6], %s424_s1, %s424_s1, %s425_s10  }
  0x24   :  { %s426_s13 = smov [#allocation8]  }
  0x25   :  { %s54_s0 = sshll.u32 %s426_s13, 4  ;;  %s55_s0 = int_to_ptr.vmem [resolvable:$true] %s54_s0 }
  0x26   :  { %s359_s14 = scalar_lea.vmem %s55_s0, 256  ;;  %p364_p2 = scmp.lt.s32.totalorder %s55_s0, %s55_s0 }
  0x27   :  { %p360_p1 = scmp.ne.s32.totalorder %s55_s0, %s359_s14  ;;  %p365_p3 = scmp.lt.s32.totalorder %s359_s14, %s359_s14 }
  0x29   :  { %p366_p4 = por %p365_p3, %p364_p2 }
  0x2b   :  { %p367_p5 = pnand %p366_p4, %p360_p1 }
  0x2d   :  { %370 = shalt.err (!%p367_p5)
}
  0x2e   :  { %60 = dma.hbm_to_vmem [thread:$0]  %s497_s3, 256, %s55_s0, [#allocation9], %s424_s1, %s424_s1, %s425_s10  }
  0x2f   :  { %411 = dma.done.wait [#allocation3], 64  }
  0x30   :  { %412 = vsyncadd [#allocation3], 4294967232 }
  0x31   :  { %413 = dma.done.wait [#allocation6], 320  }
  0x32   :  { %414 = vsyncadd [#allocation6], 4294966976 }
  0x33   :  { %415 = dma.done.wait [#allocation9], 256  }
  0x34   :  { %416 = vsyncadd [#allocation9], 4294967040  ;;  %v427_v0 = vmov 0.0   ;;  %vm428_vm0 = vmmov 0   ;;  %v287_v1 = vld [vmem:[#allocation8 + $0x8] sm:$0xff]   ;;  %v288_v2 = vld [vmem:[#allocation7 + $0x8] sm:$0xff]  }
  0x35   :  { %261 = vmatprep.subr.bf16.mxu0 %v427_v0  ;;  %269 = vmatprep.subr.bf16.mxu1 %v427_v0  ;;  %v289_v3 = vld [vmem:[#allocation8] sm:$0xff]   ;;  %v290_v4 = vld [vmem:[#allocation7] sm:$0xff]   ;;  %v81_v5 = vld [vmem:[#allocation5] sm:$0xf]  ;;  %vm98_vm1 = vcmask 261120   ;;  %s429_s17 = smov [#allocation10]  }
  0x36   :  { %265 = vmatprep.mubr.msk.bf16.mxu0 %vm428_vm0, %v427_v0  ;;  %273 = vmatprep.mubr.msk.bf16.mxu1 %vm428_vm0, %v427_v0  ;;  %v76_v6 = vld [vmem:[#allocation2] sm:$0xf]  ;;  %s221_s18 = sshll.u32 %s429_s17, 4  ;;  %vm206_vm2 = vcmask 519168   ;;  %s222_s18 = int_to_ptr.vmem [resolvable:$true] %s221_s18 }
  0x37   :  { %262 = vmatpush3.bf16.msra.mxu0 %v287_v1  ;;  %270 = vmatpush3.bf16.msra.mxu1 %v288_v2  ;;  %v252_v9 = vld [vmem:[%s498_s4] ss:$0 sm:$0xff]  ;;  %s371_s19 = scalar_lea.vmem %s222_s18, 64  ;;  %p376_p7 = scmp.lt.s32.totalorder %s222_s18, %s222_s18 }
  0x38   :  { %263 = vmatprep.subr.bf16.mxu0 %v427_v0  ;;  %271 = vmatprep.subr.bf16.mxu1 %v427_v0  ;;  %p372_p6 = scmp.ne.s32.totalorder %s222_s18, %s371_s19  ;;  %p377_p8 = scmp.lt.s32.totalorder %s371_s19, %s371_s19 }
  0x3a   :  { %p378_p9 = por %p377_p8, %p376_p7 }
  0x3b   :  { %264 = vmatpush3.bf16.msra.mxu0 %v289_v3  ;;  %272 = vmatpush3.bf16.msra.mxu1 %v290_v4 }
  0x3c   :  { %p379_p10 = pnand %p378_p9, %p372_p6 }
  0x3e   :  { %266 = vmatmul.mubr.msk.bf16.vlgmr.msra.gmra.mxu0 %vm98_vm1, %v81_v5  ;;  %274 = vmatmul.mubr.msk.bf16.vlgmr.msra.gmra.mxu1 %vm98_vm1, %v76_v6 }
  0xfe   :  { %v136_v7 = vpop.f32.mrf.mxu0  ;;  %v191_v8 = vpop.f32.mrf.mxu1 }
  0xff   :  { %v192_v10 = vadd.f32 %v191_v8, %v136_v7 }
 0x100   :  { %v267_v11 = vpop.f32.mrf.mxu0  ;;  %v275_v12 = vpop.f32.mrf.mxu1 }
 0x101   :  { %v204_v14 = vadd.f32 %v252_v9, %v192_v10 }
 0x102   :  { %v139_v13 = vpop.f32.mrf.mxu0  ;;  %v194_v15 = vpop.f32.mrf.mxu1 }
 0x103   :  { %v205_v17 = vpack.c.bf16 %v204_v14, %v204_v14 }
 0x104   :  { %v268_v16 = vpop.f32.mrf.mxu0  ;;  %v276_v18 = vpop.f32.mrf.mxu1 }
 0x105   :  { %211 = vrot.lane.b32.xlu0 %v205_v17, %s424_s1  ;;  %207 = vst.msk [vmem:[#allocation10] sm:$0xf] %vm206_vm2, %v205_v17 }
 0x106   :  { %382 = shalt.err (!%p379_p10)
}
 0x107   :  { %224 = dma.vmem_to_hbm [thread:$0]  %s222_s18, 64, %s499_s5, [#allocation4]  }
 0x108   :  { %s430_s21 = smov [#allocation11]  }
 0x109   :  { %s231_s22 = sshll.u32 %s430_s21, 4  ;;  %s232_s22 = int_to_ptr.vmem [resolvable:$true] %s231_s22 }
 0x10a   :  { %s391_s23 = scalar_lea.vmem %s232_s22, 64  ;;  %p396_p12 = scmp.lt.s32.totalorder %s232_s22, %s232_s22 }
 0x10b   :  { %p392_p11 = scmp.ne.s32.totalorder %s232_s22, %s391_s23  ;;  %p397_p13 = scmp.lt.s32.totalorder %s391_s23, %s391_s23 }
 0x10d   :  { %p398_p0 = por %p397_p13, %p396_p12 }
 0x10f   :  { %p399_p1 = pnand %p398_p0, %p392_p11 }
 0x177   :  { %v212_v19 = vpop.permute.xlu0 %211 }
 0x178   :  { %214 = vst.msk [vmem:[#allocation11] sm:$0xf] %vm206_vm2, %v212_v19 }
 0x179   :  { %402 = shalt.err (!%p399_p1)
}
 0x17a   :  { %234 = dma.vmem_to_hbm [thread:$0]  %s232_s22, 64, %s500_s6, [#allocation12]  }
 0x17b   :  { %417 = dma.done.wait [#allocation4], 64  }
 0x17c   :  { %418 = vsyncadd [#allocation4], 4294967232 }
 0x17d   :  { %419 = dma.done.wait [#allocation12], 64  }
 0x17e   :  { %420 = vsyncadd [#allocation12], 4294967232 }
 0x17f   :  { %241 = vsyncpa [#allocation3], 1 }
 0x180   :  { %242 = vsyncpa [#allocation6], 1 }
 0x181   :  { %243 = vsyncpa [#allocation9], 1 }
 0x182   :  { %244 = vsyncpa [#allocation4], 1 }
 0x183   :  { %245 = vsyncpa [#allocation12], 1 }

</bundles_post_ra>
